<compile_context>
chip_gen: v7x
topology: tpu7x:2x2x1
jax: 0.10.0
libtpu: 0.0.40
codegen_flags: <defaults>
</compile_context>

<pallas_src>
import jax
import jax.numpy as jnp
from jax.experimental import pallas as pl
from jax.experimental.pallas import tpu as pltpu

_K_PAD = 8        # K=2 contraction zero-padded to 8 columns (exact) for the MXU
_SUBLANES = 8
_LANES = 128


def _make_kl_kernel(inv_data_num):
    """Builds the per-row-block KL kernel with the mean scale baked in."""

    def _kl_kernel(h_s_ref, eT_s_ref, h_t_ref, eT_t_ref, out_ref):
        # Logits on the (otherwise idle) MXU.  K was zero-padded 2 -> 8 in the
        # wrapper, so these are ordinary (tm, 8) @ (8, cls) f32 matmuls; this
        # removes the VPU outer-product ops and the eT sublane broadcasts.
        stu = jnp.dot(h_s_ref[...], eT_s_ref[...],
                      preferred_element_type=jnp.float32,
                      precision=jax.lax.Precision.HIGHEST)            # (tm, cls)
        tea = jnp.dot(h_t_ref[...], eT_t_ref[...],
                      preferred_element_type=jnp.float32,
                      precision=jax.lax.Precision.HIGHEST)            # (tm, cls)

        # Numerically-stable shifted logits.
        # TODO(synk): a cheap per-row upper bound from precomputed eT column
        # extrema could replace these two XLU row-max passes (validate first).
        stu_shift = stu - jnp.max(stu, axis=-1, keepdims=True)        # (tm, cls)
        tea_shift = tea - jnp.max(tea, axis=-1, keepdims=True)        # (tm, cls)

        # Folded forward KL.  With
        #   lp1 = stu_shift - log(stu_sum),  lp2 = tea_shift - log(tea_sum),
        #   p2  = tea_exp / tea_sum,
        #   sum_c p2*(lp2 - lp1)
        #     = sum_c tea_exp*(tea_shift - stu_shift) / tea_sum
        #       + log(stu_sum / tea_sum)
        # so probs/log-probs are never materialized as (tm, cls) arrays.
        # TODO(synk): on v6e/v7x the exps can be computed in bf16 (EUP bf16
        # path) for ~2x exp throughput, at the cost of looser tolerances.
        stu_sum = jnp.sum(jnp.exp(stu_shift), axis=-1, keepdims=True)  # (tm, 1)
        tea_exp = jnp.exp(tea_shift)                                   # (tm, cls)
        tea_sum = jnp.sum(tea_exp, axis=-1, keepdims=True)             # (tm, 1)
        cross = jnp.sum(tea_exp * (tea_shift - stu_shift),
                        axis=-1, keepdims=True)                        # (tm, 1)

        # One log per row instead of two.  The divide is O(tm) only; kept
        # exact so the reference check stays at tight tolerance.
        # TODO(synk): cross * pl.reciprocal(tea_sum, approx=True) once a
        # looser numerical tolerance is acceptable.
        kl_rows = cross / tea_sum + jnp.log(stu_sum / tea_sum)         # (tm, 1)

        # Block partial sum with the 1/data_num mean folded in, written as one
        # full (8, 128) f32 vreg -> a single unmasked, fully-aligned store.
        block = jnp.sum(kl_rows, axis=0, keepdims=True) * inv_data_num  # (1, 1)
        out_ref[...] = jnp.broadcast_to(block, out_ref.shape).astype(out_ref.dtype)

    return _kl_kernel


def _vmem_budgets():
    """(intermediates budget, vmem_limit_bytes), gated on the chip's VMEM."""
    try:
        cap = getattr(pltpu.get_tpu_info(), "vmem_capacity_bytes", None)
    except Exception:  # conservative fallback if the query is unavailable
        cap = None
    if cap is not None and cap >= (100 << 20):   # v5e / v6e: 128 MiB physical VMEM
        return 24 << 20, 64 << 20
    return 12 << 20, 32 << 20                    # v7x (64 MiB physical) / unknown


def _pick_tiling(data_num, cls_num, budget_bytes, *, min_blocks=2, max_blocks=8):
    """Pick (tm, padded_rows, num_blocks).

    tm is always a multiple of 8 (sublane rule for the (tm, 8) h blocks) and is
    capped by a VMEM budget (~8 live (tm, cls) f32 intermediates).  We target
    ~max_blocks blocks and never fewer than min_blocks (when data allows), so
    the "parallel" grid axis can feed both v7x TensorCores.
    """
    cap = max(_SUBLANES,
              (budget_bytes // (8 * 4 * cls_num)) // _SUBLANES * _SUBLANES)
    rows8 = -(-data_num // _SUBLANES) * _SUBLANES
    target_blocks = max(min_blocks, min(max_blocks, rows8 // _SUBLANES))
    tm = -(-rows8 // target_blocks)
    tm = -(-tm // _SUBLANES) * _SUBLANES
    tm = min(tm, cap)
    padded = -(-data_num // tm) * tm
    return tm, padded, padded // tm


def net_forward_kl(h_stu, e_stu, h_tea, e_tea):
    """Computes the 'kl' loss of Net.forward(share_head=False).

    h_stu: [data_num, 2], e_stu: [cls_num, 2],
    h_tea: [data_num, 2], e_tea: [cls_num, 2].  Returns scalar float32 loss.
    """
    data_num = h_stu.shape[0]
    cls_num = e_stu.shape[0]
    k_in = h_stu.shape[1]

    budget, vmem_limit = _vmem_budgets()
    tm, padded_num, num_blocks = _pick_tiling(data_num, cls_num, budget)

    # Glue: zero-pad rows to a multiple of tm (padded rows give identical
    # all-zero student/teacher logit rows -> uniform softmaxes -> exactly zero
    # KL, so no in-kernel mask is needed) and zero-pad K from 2 to 8 so the
    # contraction is an ordinary MXU matmul.  Embeddings are pre-transposed.
    h_s = jnp.pad(h_stu.astype(jnp.float32),
                  ((0, padded_num - data_num), (0, _K_PAD - k_in)))
    h_t = jnp.pad(h_tea.astype(jnp.float32),
                  ((0, padded_num - data_num), (0, _K_PAD - k_in)))
    eT_s = jnp.pad(jnp.transpose(e_stu).astype(jnp.float32),
                   ((0, _K_PAD - k_in), (0, 0)))                     # (8, cls)
    eT_t = jnp.pad(jnp.transpose(e_tea).astype(jnp.float32),
                   ((0, _K_PAD - k_in), (0, 0)))                     # (8, cls)

    cost = pl.CostEstimate(
        flops=(2 * 2 * _K_PAD + 10) * padded_num * cls_num,   # 2 matmuls + elementwise
        transcendentals=2 * padded_num * cls_num,             # two exps per logit element
        bytes_accessed=4 * (2 * padded_num * _K_PAD + 2 * _K_PAD * cls_num
                            + num_blocks * _SUBLANES * _LANES),
    )

    # TODO(synk): for very large cls_num, tile the class axis with an online
    # (flash-style) running max/sum instead of full (K, cls_num) blocks.
    kl_part = pl.pallas_call(
        _make_kl_kernel(1.0 / data_num),
        out_shape=jax.ShapeDtypeStruct((num_blocks * _SUBLANES, _LANES), jnp.float32),
        grid_spec=pltpu.PrefetchScalarGridSpec(
            num_scalar_prefetch=0,
            grid=(num_blocks,),
            in_specs=[
                pl.BlockSpec((tm, _K_PAD), lambda i: (i, 0)),        # h_stu tile
                pl.BlockSpec((_K_PAD, cls_num), lambda i: (0, 0)),   # e_stu^T (full)
                pl.BlockSpec((tm, _K_PAD), lambda i: (i, 0)),        # h_tea tile
                pl.BlockSpec((_K_PAD, cls_num), lambda i: (0, 0)),   # e_tea^T (full)
            ],
            out_specs=pl.BlockSpec((_SUBLANES, _LANES), lambda i: (i, 0)),
        ),
        compiler_params=pltpu.CompilerParams(
            dimension_semantics=("parallel",),   # row blocks split across v7x cores
            vmem_limit_bytes=vmem_limit,
        ),
        cost_estimate=cost,
    )(h_s, eT_s, h_t, eT_t)

    # Every element of block i's (8, 128) tile holds (block-i KL sum)/data_num.
    if num_blocks == 1:
        return kl_part[0, 0]
    return jnp.sum(kl_part.reshape(num_blocks, _SUBLANES, _LANES)[:, 0, 0])


if __name__ == "__main__":
    # Small shapes consistent with the module: data_num matches the module
    # default (100, exercising the pad-to-tile path), cls_num kept small.
    data_num = 100
    cls_num = 256

    key = jax.random.PRNGKey(0)
    k1, k2, k3, k4 = jax.random.split(key, 4)

    # Deterministic parameter init mirroring Net.__init__ (share_head=False path):
    h1 = jax.random.normal(k1, (data_num, 2), dtype=jnp.float32) + 3.0   # self.h1
    e1 = jax.random.normal(k2, (cls_num, 2), dtype=jnp.float32)          # self.e1
    h3 = jax.random.normal(k3, (data_num, 2), dtype=jnp.float32) * 2.0   # self.h3
    e3 = jax.random.normal(k4, (cls_num, 2), dtype=jnp.float32)          # self.e3

    loss = jax.block_until_ready(net_forward_kl(h1, e1, h3, e3))

    # Pure-JAX reference for sanity check.
    def ref(h_s, e_s, h_t, e_t):
        stu = h_s @ e_s.T
        tea = h_t @ e_t.T
        lp1 = jax.nn.log_softmax(stu, -1)
        p2 = jax.nn.softmax(tea, -1)
        lp2 = jax.nn.log_softmax(tea, -1)
        return jnp.mean(jnp.sum(p2 * (lp2 - lp1), -1))

    ref_loss = ref(h1, e1, h3, e3)
    assert jnp.allclose(loss, ref_loss, rtol=1e-4, atol=1e-4), (loss, ref_loss)

    print("KERNEL_OK")
</pallas_src>

<mosaic_0001>
module attributes {stable_mosaic.version = 11 : i64} {
  func.func @_kl_kernel(%arg0: i32, %arg1: memref<16x8xf32, #tpu.memory_space<vmem>>, %arg2: memref<8x256xf32, #tpu.memory_space<vmem>>, %arg3: memref<16x8xf32, #tpu.memory_space<vmem>>, %arg4: memref<8x256xf32, #tpu.memory_space<vmem>>, %arg5: memref<8x128xf32, #tpu.memory_space<vmem>>) attributes {dimension_semantics = [#tpu.dimension_semantics<parallel>], iteration_bounds = array<i64: 7>, scalar_prefetch = 0 : i64, scratch_operands = 0 : i64, tpu.core_type = #tpu.core_type<tc>, window_params = [{transform_indices = @transform_0, window_bounds = array<i64: 16, 8>}, {pipeline_mode = #tpu.pipeline_mode<synchronous>, transform_indices = @transform_1, window_bounds = array<i64: 8, 256>}, {transform_indices = @transform_2, window_bounds = array<i64: 16, 8>}, {pipeline_mode = #tpu.pipeline_mode<synchronous>, transform_indices = @transform_3, window_bounds = array<i64: 8, 256>}, {transform_indices = @transform_4, window_bounds = array<i64: 8, 128>}]} {
    %c0 = arith.constant 0 : index
    %c0_0 = arith.constant 0 : index
    %0 = vector.load %arg1[%c0, %c0_0] : memref<16x8xf32, #tpu.memory_space<vmem>>, vector<16x8xf32>
    %c0_1 = arith.constant 0 : index
    %c0_2 = arith.constant 0 : index
    %1 = vector.load %arg2[%c0_1, %c0_2] : memref<8x256xf32, #tpu.memory_space<vmem>>, vector<8x256xf32>
    %cst = arith.constant dense<0.000000e+00> : vector<16x256xf32>
    %2 = tpu.matmul %0, %1, %cst {dimension_numbers = #tpu.dot_dimension_numbers<[1], [0], [0], [1], [0, 0, 1, 1], [], []>, precision = #tpu.contract_precision<fp32>} : vector<16x8xf32>, vector<8x256xf32>, vector<16x256xf32> -> vector<16x256xf32>
    %c0_3 = arith.constant 0 : index
    %c0_4 = arith.constant 0 : index
    %3 = vector.load %arg3[%c0_3, %c0_4] : memref<16x8xf32, #tpu.memory_space<vmem>>, vector<16x8xf32>
    %c0_5 = arith.constant 0 : index
    %c0_6 = arith.constant 0 : index
    %4 = vector.load %arg4[%c0_5, %c0_6] : memref<8x256xf32, #tpu.memory_space<vmem>>, vector<8x256xf32>
    %cst_7 = arith.constant dense<0.000000e+00> : vector<16x256xf32>
    %5 = tpu.matmul %3, %4, %cst_7 {dimension_numbers = #tpu.dot_dimension_numbers<[1], [0], [0], [1], [0, 0, 1, 1], [], []>, precision = #tpu.contract_precision<fp32>} : vector<16x8xf32>, vector<8x256xf32>, vector<16x256xf32> -> vector<16x256xf32>
    %cst_8 = arith.constant dense<0xFF800000> : vector<16xf32>
    %6 = vector.multi_reduction <maximumf>, %2, %cst_8 [1] : vector<16x256xf32> to vector<16xf32>
    %7 = vector.shape_cast %6 : vector<16xf32> to vector<16x1xf32>
    %8 = vector.broadcast %7 : vector<16x1xf32> to vector<16x256xf32>
    %9 = arith.subf %2, %8 : vector<16x256xf32>
    %cst_9 = arith.constant dense<0xFF800000> : vector<16xf32>
    %10 = vector.multi_reduction <maximumf>, %5, %cst_9 [1] : vector<16x256xf32> to vector<16xf32>
    %11 = vector.shape_cast %10 : vector<16xf32> to vector<16x1xf32>
    %12 = vector.broadcast %11 : vector<16x1xf32> to vector<16x256xf32>
    %13 = arith.subf %5, %12 : vector<16x256xf32>
    %14 = math.exp %9 : vector<16x256xf32>
    %cst_10 = arith.constant dense<0.000000e+00> : vector<16xf32>
    %15 = vector.multi_reduction <add>, %14, %cst_10 [1] : vector<16x256xf32> to vector<16xf32>
    %16 = vector.shape_cast %15 : vector<16xf32> to vector<16x1xf32>
    %17 = math.exp %13 : vector<16x256xf32>
    %cst_11 = arith.constant dense<0.000000e+00> : vector<16xf32>
    %18 = vector.multi_reduction <add>, %17, %cst_11 [1] : vector<16x256xf32> to vector<16xf32>
    %19 = vector.shape_cast %18 : vector<16xf32> to vector<16x1xf32>
    %20 = arith.subf %13, %9 : vector<16x256xf32>
    %21 = arith.mulf %17, %20 : vector<16x256xf32>
    %cst_12 = arith.constant dense<0.000000e+00> : vector<16xf32>
    %22 = vector.multi_reduction <add>, %21, %cst_12 [1] : vector<16x256xf32> to vector<16xf32>
    %23 = vector.shape_cast %22 : vector<16xf32> to vector<16x1xf32>
    %24 = arith.divf %23, %19 : vector<16x1xf32>
    %25 = arith.divf %16, %19 : vector<16x1xf32>
    %26 = math.log %25 : vector<16x1xf32>
    %27 = arith.addf %24, %26 : vector<16x1xf32>
    %cst_13 = arith.constant dense<0.000000e+00> : vector<1xf32>
    %28 = vector.multi_reduction <add>, %27, %cst_13 [0] : vector<16x1xf32> to vector<1xf32>
    %29 = vector.shape_cast %28 : vector<1xf32> to vector<1x1xf32>
    %cst_14 = arith.constant 0.00999999977 : f32
    %30 = vector.broadcast %cst_14 : f32 to vector<1x1xf32>
    %31 = arith.mulf %29, %30 : vector<1x1xf32>
    %32 = vector.shape_cast %31 : vector<1x1xf32> to vector<1x1xf32>
    %33 = vector.broadcast %32 : vector<1x1xf32> to vector<8x128xf32>
    %c0_15 = arith.constant 0 : index
    %c0_16 = arith.constant 0 : index
    %34 = vector.load %arg5[%c0_15, %c0_16] : memref<8x128xf32, #tpu.memory_space<vmem>>, vector<8x128xf32>
    tpu.vector_store %arg5[%c0_15, %c0_16], %33 {strides = array<i32>} : memref<8x128xf32, #tpu.memory_space<vmem>>, vector<8x128xf32>,
    return
  }
  func.func @transform_0(%arg0: i32) -> (i32, i32) {
    %c0_i32 = arith.constant 0 : i32
    %c0_i32_0 = arith.constant 0 : i32
    return %arg0, %c0_i32 : i32, i32
  }
  func.func @transform_1(%arg0: i32) -> (i32, i32) {
    %c0_i32 = arith.constant 0 : i32
    %c0_i32_0 = arith.constant 0 : i32
    %c0_i32_1 = arith.constant 0 : i32
    return %c0_i32, %c0_i32_0 : i32, i32
  }
  func.func @transform_2(%arg0: i32) -> (i32, i32) {
    %c0_i32 = arith.constant 0 : i32
    %c0_i32_0 = arith.constant 0 : i32
    return %arg0, %c0_i32 : i32, i32
  }
  func.func @transform_3(%arg0: i32) -> (i32, i32) {
    %c0_i32 = arith.constant 0 : i32
    %c0_i32_0 = arith.constant 0 : i32
    %c0_i32_1 = arith.constant 0 : i32
    return %c0_i32, %c0_i32_0 : i32, i32
  }
  func.func @transform_4(%arg0: i32) -> (i32, i32) {
    %c0_i32 = arith.constant 0 : i32
    %c0_i32_0 = arith.constant 0 : i32
    return %arg0, %c0_i32 : i32, i32
  }
}

</mosaic_0001>

<bundles_post_ra>
// kernel: tpu_custom_call.1
= control target key start
LH: loop header
LB: loop body
LE: loop exit
PB: predicated region body
PF: predicated region fallthrough
CT: control target
= control target key end

     0   :  { %9 = vsyncpa [#allocation3], 0  ;;  %s1871_s0 = inlined_call_operand.vmem [shape: f32[112,8], index: 0, kind: input, shape index: {}]   ;;  %s1872_s1 = inlined_call_operand.vmem [shape: f32[8,256], index: 1, kind: input, shape index: {}]   ;;  %s1873_s2 = inlined_call_operand.vmem [shape: f32[112,8], index: 2, kind: input, shape index: {}]   ;;  %s1874_s3 = inlined_call_operand.vmem [shape: f32[8,256], index: 3, kind: input, shape index: {}]   ;;  %s1875_s4 = inlined_call_operand.hbm [shape: f32[56,128], index: 4, kind: output, shape index: {}]  }
   0x1   :  { %11 = vsyncpa [#allocation3 + $0x1], 0  ;;  %s1645_s15 = smov 0   ;;  %s1647_s16 = smov 0  }
   0x2   :  { %s1649_s17 = smov 0   ;;  %s1651_s18 = smov 0  }
   0x3 LB: > { %s1666_s19 = sadd.s32 4294967295, %s1616_s18   ;;  %s1437_s20 = sadd.s32 4294967294, %s1616_s18   ;;  %s1616_s18 = sphi %s1651_s18, %s1881_s18   ;;  %s1612_s17 = sphi %s1649_s17, %s1880_s17   ;;  %s1608_s16 = sphi %s1647_s16, %s1879_s16   ;;  %s1604_s15 = sphi %s1645_s15, %s1878_s15  }
   0x4   : > { %s1670_s21 = sadd.s32 1, %s1616_s18   ;;  %s118_s22 = sadd.s32 1, %s1612_s17 }
   0x5   : > { %s115_s23 = ssub.s32 %s1616_s18, %s1670_s21  ;;  %p128_p0 = scmp.ne.s32.totalorder %s1612_s17, %s1608_s16 }
   0x6   : > { %p116_p1 = scmp.eq.s32.totalorder %s115_s23, 0  ;;  %p129_p2 = scmp.eq.s32.totalorder %s1666_s19, 6 }
   0x7   : > { %p134_p3 = scmp.ne.s32.totalorder %s1608_s16, %s1604_s15  ;;  %p135_p4 = scmp.eq.s32.totalorder %s1437_s20, 6 }
   0x8   : > { %s1681_s24 = scalar_select %p116_p1, %s1612_s17, %s118_s22  }
   0x9   : > { %p1683_p5 = por %p129_p2, %p128_p0  ;;  %p1687_p6 = por %p135_p4, %p134_p3 }
   0xa   : > { %p1440_p7 = scmp.ge.s32.totalorder %s1616_s18, 1  ;;  %p177_p8 = scmp.lt.s32.totalorder %s1616_s18, 8 }
   0xc   : > { %p178_p9 = pnand %p1440_p7, %p177_p8 }
   0xd   : > { %v748_v0 = vld [vmem:[%s1874_s3 + $0x8] sm:$0xff] (!%p178_p9)  ;;  %v747_v2 = vld [vmem:[%s1874_s3] sm:$0xff] (!%p178_p9)  ;;  %s1442_s7 = sshll.u32 (!%p178_p9), %s1666_s19, 1  ;;  %v1618_v7 = vmov (!%p178_p9), 0.0   ;;  %vm224_vm0 = vcmask (!%p178_p9), 64512   ;;  %s205_s23 = sand.u32 (!%p178_p9), 1, %s1608_s16  }
   0xe   : > { %181 = sbr.rel (%p178_p9) target bundleno = 656 (0x290), region = 36  ;;  %v223_v1 = vld [vmem:[%s1872_s1 + $0x8] sm:$0xff] (!%p178_p9)  ;;  %v1703_v3 = vand.u32 (!%p178_p9), 4294901760, %v748_v0  ;;  %v1707_v5 = vand.u32 (!%p178_p9), 4294901760, %v747_v2  ;;  %v222_v6 = vld [vmem:[%s1872_s1] sm:$0xff] (!%p178_p9)  ;;  %297 = vmatprep.mubr.f32.mxu0 (!%p178_p9), %v1618_v7  ;;  %821 = vmatprep.mubr.f32.mxu1 (!%p178_p9), %v1618_v7  ;;  %p209_p10 = scmp.lt.s32.totalorder (!%p178_p9), %s1442_s7, 13 }
   0xf   : > { %v1705_v4 = vand.u32 (!%p178_p9), 4294901760, %v223_v1  ;;  %v1714_v8 = vand.u32 (!%p178_p9), 4294901760, %v222_v6  ;;  %s1441_s27 = sshll.u32 (!%p178_p9), %s205_s23, 3  ;;  %s1447_s28 = sshll.u32 (!%p178_p9), %s1666_s19, 7 }
  0x10   : > { %756 = vmatprep.subr.mxu1 (!%p178_p9), %v1703_v3  ;;  %v1719_v9 = vsub.f32 (!%p178_p9), %v748_v0, %v1703_v3  ;;  %v1726_v11 = vsub.f32 (!%p178_p9), %v747_v2, %v1707_v5  ;;  %s207_s29 = scalar_lea.vmem (!%p178_p9), [#allocation2], %s1441_s27  ;;  %s1353_s8 = scalar_lea.sflag (!%p178_p9), [#allocation3], %s205_s23 }
  0x11   : > { %232 = vmatprep.subr.mxu0 (!%p178_p9), %v1705_v4  ;;  %v1722_v10 = vsub.f32 (!%p178_p9), %v223_v1, %v1705_v4  ;;  %758 = vmatpush1.msra.mxu1 (!%p178_p9), %v1707_v5  ;;  %v1730_v12 = vsub.f32 (!%p178_p9), %v222_v6, %v1714_v8  ;;  %s1366_s30 = sshll.u32 (!%p178_p9), %s207_s29, 4  ;;  %s1619_s19 = smov (!%p178_p9), [#allocation2]   ;;  %s1831_s30 = int_to_ptr.vmem [resolvable:$true] %s1366_s30 }
  0x12   : > { %234 = vmatpush1.msra.mxu0 (!%p178_p9), %v1714_v8  ;;  %v846_v13 = vand.u32 (!%p178_p9), 4294901760, %v1719_v9  ;;  %v852_v22 = vand.u32 (!%p178_p9), 4294901760, %v1726_v11  ;;  %s1554_s9 = scalar_lea.vmem (!%p178_p9), %s1831_s30, 128 }
  0x13   : > { %v322_v14 = vand.u32 (!%p178_p9), 4294901760, %v1722_v10  ;;  %v328_v28 = vand.u32 (!%p178_p9), 4294901760, %v1730_v12  ;;  %p1555_p11 = scmp.ne.s32.totalorder (!%p178_p9), %s1831_s30, %s1554_s9 }
  0x14   : > { %v847_v15 = vsub.f32 (!%p178_p9), %v1719_v9, %v846_v13  ;;  %v853_v35 = vsub.f32 (!%p178_p9), %v1726_v11, %v852_v22 }
  0x15   : > { %s1883_s7 = smov (!%p209_p10, %s1442_s7), 13  ;;  %v323_v19 = vsub.f32 %v1722_v10, %v322_v14  ;;  %v329_v40 = vsub.f32 %v1730_v12, %v328_v28  ;;  %p1556_p12 = pnand %p1555_p11, %p1683_p5 }
  0x16   : > { %s1443_s10 = sshll.u32 %s1883_s7, 3  ;;  %v848_v25 = vand.u32 4294901760, %v847_v15  ;;  %v854_v45 = vand.u32 4294901760, %v853_v35  ;;  %s1829_s7 = scalar_lea.hbm %s1875_s4, %s1447_s28 }
  0x17   : > { %s212_s13 = scalar_lea.vmem %s1871_s0, %s1443_s10  ;;  %s218_s22 = scalar_lea.vmem %s1873_s2, %s1443_s10  ;;  %v324_v31 = vand.u32 4294901760, %v323_v19  ;;  %v330_v50 = vand.u32 4294901760, %v329_v40 }
  0x18   : > { %v220_v16 = vld [vmem:[%s212_s13] sm:$0xff]  ;;  %v221_v18 = vld [vmem:[%s212_s13 + $0x8] sm:$0xff]  ;;  %849 = vmatprep.subr.mxu1 %v848_v25  ;;  %p1557_p13 = pneg %p1556_p12  ;;  %s1558_s10 = sshll.u32 %s1619_s19, 4  ;;  %s1559_s10 = int_to_ptr.vmem [resolvable:$false] %s1558_s10 }
  0x19   : > { %v745_v17 = vld [vmem:[%s218_s22] sm:$0xff]  ;;  %v226_v20 = vsel %vm224_vm0, %v220_v16, 0  ;;  %v229_v23 = vsel %vm224_vm0, %v221_v18, 0  ;;  %v746_v24 = vld [vmem:[%s218_s22 + $0x8] sm:$0xff]  ;;  %325 = vmatprep.subr.mxu0 %v324_v31  ;;  %s1560_s11 = scalar_lea.vmem %s1559_s10, 256  ;;  %p1561_p0 = scmp.lt.s32.totalorder %s1831_s30, %s1559_s10 }
  0x1a   : > { %v750_v21 = vsel %vm224_vm0, %v745_v17, 0  ;;  %v1750_v26 = vand.u32 4294901760, %v226_v20  ;;  %v1755_v29 = vand.u32 4294901760, %v229_v23  ;;  %v753_v30 = vsel %vm224_vm0, %v746_v24, 0  ;;  %p1562_p1 = scmp.lt.s32.totalorder %s1560_s11, %s1554_s9 }
  0x1b   : > { %v1752_v27 = vand.u32 4294901760, %v750_v21  ;;  %v1760_v34 = vand.u32 4294901760, %v753_v30 }
  0x1c   : > { %v299_v32 = vsub.f32 %v226_v20, %v1750_v26  ;;  %v310_v36 = vsub.f32 %v229_v23, %v1755_v29  ;;  %p1563_p2 = por %p1562_p1, %p1561_p0 }
  0x1d   : > { %v823_v33 = vsub.f32 %v750_v21, %v1752_v27  ;;  %v834_v39 = vsub.f32 %v753_v30, %v1760_v34 }
  0x1e   : > { %v300_v37 = vand.u32 4294901760, %v299_v32  ;;  %v311_v41 = vand.u32 4294901760, %v310_v36  ;;  %p1564_p3 = pnand %p1563_p2, %p1557_p13 }
  0x1f   : > { %v824_v38 = vand.u32 4294901760, %v823_v33  ;;  %v835_v44 = vand.u32 4294901760, %v834_v39 }
  0x20   : > { %v301_v42 = vsub.f32 %v299_v32, %v300_v37  ;;  %v312_v46 = vsub.f32 %v310_v36, %v311_v41 }
  0x21   : > { %v825_v43 = vsub.f32 %v823_v33, %v824_v38  ;;  %v836_v49 = vsub.f32 %v834_v39, %v835_v44 }
  0x22   : > { %v302_v47 = vand.u32 4294901760, %v301_v42  ;;  %v313_v51 = vand.u32 4294901760, %v312_v46 }
  0x23   : > { %v826_v48 = vand.u32 4294901760, %v825_v43  ;;  %v837_v52 = vand.u32 4294901760, %v836_v49 }
  0x24   : > { %303 = vmatmul.mubr.f32.vlgmr.msra.gmra.mrb[0].mxu0 %v302_v47 }
  0x25   : > { %827 = vmatmul.mubr.f32.vlgmr.msra.gmra.mrb[0].mxu1 %v826_v48  ;;  %308 = vmatprep.mubr.f32.mxu0 %v1618_v7 }
  0x26   : > { %855 = vmatpush1.msra.mxu1 %v854_v45  ;;  %832 = vmatprep.mubr.f32.mxu1 %v1618_v7 }
  0x27   : > { %331 = vmatpush1.msra.mxu0 %v330_v50  ;;  %935 = vmatprep.subr.mxu1 %v1719_v9 }
  0x28   : > { %411 = vmatprep.subr.mxu0 %v1722_v10  ;;  %314 = vmatmul.mubr.f32.gmra.mrb[2].mxu0 %v313_v51 }
  0x29   : > { %838 = vmatmul.mubr.f32.gmra.mrb[2].mxu1 %v837_v52  ;;  %394 = vmatprep.mubr.f32.mxu0 %v1618_v7 }
  0x2a   : > { %918 = vmatprep.mubr.f32.mxu1 %v1618_v7 }
  0x2c   : > { %396 = vmatmul.mubr.f32.vlgmr.msra.gmra.mrb[0].mxu0 %v1750_v26 }
  0x2d   : > { %920 = vmatmul.mubr.f32.vlgmr.msra.gmra.mrb[0].mxu1 %v1752_v27  ;;  %401 = vmatprep.mubr.f32.mxu0 %v1618_v7 }
  0x2e   : > { %938 = vmatpush1.msra.mxu1 %v1726_v11  ;;  %925 = vmatprep.mubr.f32.mxu1 %v1618_v7 }
  0x2f   : > { %414 = vmatpush1.msra.mxu0 %v1730_v12  ;;  %1019 = vmatprep.subr.mxu1 %v1703_v3 }
  0x30   : > { %495 = vmatprep.subr.mxu0 %v1705_v4  ;;  %403 = vmatmul.mubr.f32.gmra.mrb[2].mxu0 %v1755_v29 }
  0x31   : > { %927 = vmatmul.mubr.f32.gmra.mrb[2].mxu1 %v1760_v34  ;;  %477 = vmatprep.mubr.f32.mxu0 %v1618_v7 }
  0x32   : > { %1001 = vmatprep.mubr.f32.mxu1 %v1618_v7 }
  0x34   : > { %480 = vmatmul.mubr.f32.vlgmr.msra.gmra.mrb[0].mxu0 %v299_v32 }
  0x35   : > { %1004 = vmatmul.mubr.f32.vlgmr.msra.gmra.mrb[0].mxu1 %v823_v33  ;;  %485 = vmatprep.mubr.f32.mxu0 %v1618_v7 }
  0x36   : > { %1021 = vmatpush1.msra.mxu1 %v1707_v5  ;;  %1009 = vmatprep.mubr.f32.mxu1 %v1618_v7 }
  0x37   : > { %497 = vmatpush1.msra.mxu0 %v1714_v8  ;;  %1106 = vmatprep.subr.mxu1 %v846_v13 }
  0x38   : > { %582 = vmatprep.subr.mxu0 %v322_v14  ;;  %488 = vmatmul.mubr.f32.gmra.mrb[2].mxu0 %v310_v36 }
  0x39   : > { %1012 = vmatmul.mubr.f32.gmra.mrb[2].mxu1 %v834_v39  ;;  %560 = vmatprep.mubr.f32.mxu0 %v1618_v7 }
  0x3a   : > { %1084 = vmatprep.mubr.f32.mxu1 %v1618_v7 }
  0x3c   : > { %564 = vmatmul.mubr.f32.vlgmr.msra.gmra.mrb[0].mxu0 %v300_v37 }
  0x3d   : > { %1088 = vmatmul.mubr.f32.vlgmr.msra.gmra.mrb[0].mxu1 %v824_v38  ;;  %569 = vmatprep.mubr.f32.mxu0 %v1618_v7 }
  0x3e   : > { %1110 = vmatpush1.msra.mxu1 %v852_v22  ;;  %1093 = vmatprep.mubr.f32.mxu1 %v1618_v7 }
  0x3f   : > { %586 = vmatpush1.msra.mxu0 %v328_v28  ;;  %1189 = vmatprep.subr.mxu1 %v1703_v3 }
  0x40   : > { %665 = vmatprep.subr.mxu0 %v1705_v4  ;;  %573 = vmatmul.mubr.f32.gmra.mrb[2].mxu0 %v311_v41 }
  0x41   : > { %1097 = vmatmul.mubr.f32.gmra.mrb[2].mxu1 %v835_v44  ;;  %649 = vmatprep.mubr.f32.mxu0 %v1618_v7 }
  0x42   : > { %1173 = vmatprep.mubr.f32.mxu1 %v1618_v7 }
  0x44   : > { %651 = vmatmul.mubr.f32.vlgmr.msra.gmra.mrb[0].mxu0 %v1750_v26 }
  0x45   : > { %1175 = vmatmul.mubr.f32.vlgmr.msra.gmra.mrb[0].mxu1 %v1752_v27  ;;  %656 = vmatprep.mubr.f32.mxu0 %v1618_v7 }
  0x46   : > { %1191 = vmatpush1.msra.mxu1 %v1707_v5  ;;  %1180 = vmatprep.mubr.f32.mxu1 %v1618_v7 }
  0x47   : > { %667 = vmatpush1.msra.mxu0 %v1714_v8 }
  0x48   : > { %658 = vmatmul.mubr.f32.gmra.mrb[2].mxu0 %v1755_v29 }
  0x49   : > { %1182 = vmatmul.mubr.f32.gmra.mrb[2].mxu1 %v1760_v34  ;;  %730 = vmatprep.mubr.f32.mxu0 %v1618_v7 }
  0x4a   : > { %1254 = vmatprep.mubr.f32.mxu1 %v1618_v7 }
  0x4c   : > { %732 = vmatmul.mubr.f32.vlgmr.msra.gmra.mrb[0].mxu0 %v1750_v26 }
  0x4d   : > { %1256 = vmatmul.mubr.f32.vlgmr.msra.gmra.mrb[0].mxu1 %v1752_v27  ;;  %737 = vmatprep.mubr.f32.mxu0 %v1618_v7 }
  0x4e   : > { %1261 = vmatprep.mubr.f32.mxu1 %v1618_v7 }
  0x50   : > { %739 = vmatmul.mubr.f32.gmra.mrb[2].mxu0 %v1755_v29 }
  0x51   : > { %1263 = vmatmul.mubr.f32.gmra.mrb[2].mxu1 %v1760_v34 }
 0x11f   : > { %v733_v53 = vpop.f32.mrb[0].mxu0 }
 0x120   : > { %v1257_v54 = vpop.f32.mrb[0].mxu1  ;;  %v735_v55 = vpop.f32.mrb[1].mxu0 }
 0x121   : > { %v1259_v56 = vpop.f32.mrb[1].mxu1  ;;  %v1269_v58 = vmax.f32 %v733_v53, %v735_v55 }
 0x122   : > { %v1279_v57 = vmax.f32 %v1257_v54, %v1259_v56 }
 0x123   : > { %1270 = vmax.xlane.f32.xlu1 %v1269_v58  ;;  %v740_v60 = vpop.f32.mrb[2].mxu0 }
 0x124   : > { %1280 = vmax.xlane.f32.xlu0 %v1279_v57  ;;  %v1264_v59 = vpop.f32.mrb[2].mxu1  ;;  %v742_v61 = vpop.f32.mrb[3].mxu0 }
 0x125   : > { %v1266_v62 = vpop.f32.mrb[3].mxu1  ;;  %v1272_v63 = vmax.f32 %v740_v60, %v742_v61 }
 0x126   : > { %v1282_v0 = vmax.f32 %v1264_v59, %v1266_v62 }
 0x127   : > { %1273 = vmax.xlane.f32.xlu1 %v1272_v63 }
 0x128   : > { %1283 = vmax.xlane.f32.xlu0 %v1282_v0 }
 0x1b0   : > { %v1271_v2 = vpop.xlane.xlu1 %1270 }
 0x1b1   : > { %v1281_v1 = vpop.xlane.xlu0 %1280  ;;  %v1275_v5 = vsub.f32 %v733_v53, %v1271_v2  ;;  %v1276_v6 = vsub.f32 %v735_v55, %v1271_v2 }
 0x1b2   : > { %v1285_v3 = vsub.f32 %v1257_v54, %v1281_v1  ;;  %v1286_v4 = vsub.f32 %v1259_v56, %v1281_v1 }
 0x1b3   : > { %v1289_v9 = vmul.f32 1.442695, %v1275_v5  ;;  %v1291_v11 = vmul.f32 1.442695, %v1276_v6 }
 0x1b4   : > { %v1303_v7 = vmul.f32 1.442695, %v1285_v3  ;;  %v1305_v8 = vmul.f32 1.442695, %v1286_v4  ;;  %v1317_v10 = vsub.f32 %v1285_v3, %v1275_v5  ;;  %v1318_v12 = vsub.f32 %v1286_v4, %v1276_v6  ;;  %v1274_v14 = vpop.xlane.xlu1 %1273 }
 0x1b5   : > { %v1284_v13 = vpop.xlane.xlu0 %1283  ;;  %v1277_v17 = vsub.f32 %v740_v60, %v1274_v14  ;;  %v1278_v18 = vsub.f32 %v742_v61, %v1274_v14 }
 0x1b6   : > { %1530 = vpow2.f32 %v1303_v7  ;;  %v1287_v15 = vsub.f32 %v1264_v59, %v1284_v13  ;;  %v1288_v16 = vsub.f32 %v1266_v62, %v1284_v13 }
 0x1b7   : > { %1532 = vpow2.f32 %v1305_v8  ;;  %v1293_v21 = vmul.f32 1.442695, %v1277_v17  ;;  %v1295_v22 = vmul.f32 1.442695, %v1278_v18 }
 0x1b8   : > { %1534 = vpow2.f32 %v1289_v9  ;;  %v1307_v19 = vmul.f32 1.442695, %v1287_v15  ;;  %v1309_v20 = vmul.f32 1.442695, %v1288_v16  ;;  %v1319_v23 = vsub.f32 %v1287_v15, %v1277_v17 }
 0x1b9   : > { %1536 = vpow2.f32 %v1291_v11  ;;  %v1320_v24 = vsub.f32 %v1288_v16, %v1278_v18 }
 0x1ba   : > { %1538 = vpow2.f32 %v1307_v19 }
 0x1bb   : > { %1540 = vpow2.f32 %v1309_v20 }
 0x1bc   : > { %1542 = vpow2.f32 %v1293_v21 }
 0x1bd   : > { %1544 = vpow2.f32 %v1295_v22 }
 0x1c0   : > { %v1531_v25 = vpop.eup %1530 }
 0x1c1   : > { %v1533_v26 = vpop.eup %1532  ;;  %v1321_v27 = vmul.f32 %v1531_v25, %v1317_v10 }
 0x1c2   : > { %v1535_v28 = vpop.eup %1534  ;;  %v1311_v29 = vadd.f32 %v1533_v26, %v1531_v25  ;;  %v1322_v30 = vmul.f32 %v1533_v26, %v1318_v12 }
 0x1c3   : > { %v1537_v31 = vpop.eup %1536 }
 0x1c4   : > { %v1539_v32 = vpop.eup %1538  ;;  %1312 = vadd.xlane.f32.xlu0 %v1311_v29  ;;  %v1297_v33 = vadd.f32 %v1537_v31, %v1535_v28  ;;  %v1325_v34 = vadd.f32 %v1322_v30, %v1321_v27 }
 0x1c5   : > { %v1541_v35 = vpop.eup %1540  ;;  %v1323_v36 = vmul.f32 %v1539_v32, %v1319_v23 }
 0x1c6   : > { %v1543_v37 = vpop.eup %1542  ;;  %v1314_v38 = vadd.f32 %v1541_v35, %v1539_v32  ;;  %v1324_v39 = vmul.f32 %v1541_v35, %v1320_v24 }
 0x1c7   : > { %v1545_v40 = vpop.eup %1544 }
 0x1c8   : > { %1298 = vadd.xlane.f32.xlu0 %v1297_v33  ;;  %1315 = vadd.xlane.f32.xlu1 %v1314_v38  ;;  %v1300_v41 = vadd.f32 %v1545_v40, %v1543_v37  ;;  %v1328_v42 = vadd.f32 %v1324_v39, %v1323_v36 }
 0x1cc   : > { %1326 = vadd.xlane.f32.xlu0 %v1325_v34  ;;  %1301 = vadd.xlane.f32.xlu1 %v1300_v41 }
 0x1d0   : > { %1329 = vadd.xlane.f32.xlu1 %v1328_v42 }
 0x251   : > { %v1313_v43 = vpop.xlane.xlu0 %1312 }
 0x252   : > { %1546 = vrcp.f32 %v1313_v43 }
 0x255   : > { %v1316_v44 = vpop.xlane.xlu1 %1315  ;;  %v1299_v46 = vpop.xlane.xlu0 %1298 }
 0x256   : > { %1548 = vrcp.f32 %v1316_v44 }
 0x259   : > { %v1302_v49 = vpop.xlane.xlu1 %1301  ;;  %v1327_v54 = vpop.xlane.xlu0 %1326 }
 0x25c   : > { %v1547_v45 = vpop.eup %1546 }
 0x25d   : > { %v1335_v47 = vmul.f32 %v1547_v45, %v1299_v46  ;;  %v1330_v55 = vpop.xlane.xlu1 %1329  ;;  %v1332_v56 = vmul.f32 %v1547_v45, %v1327_v54 }
 0x25f   : > { %1550 = vlog2.f32 %v1335_v47 }
 0x260   : > { %v1549_v48 = vpop.eup %1548 }
 0x261   : > { %v1336_v50 = vmul.f32 %v1549_v48, %v1302_v49  ;;  %v1334_v58 = vmul.f32 %v1549_v48, %v1330_v55 }
 0x263   : > { %1552 = vlog2.f32 %v1336_v50 }
 0x269   : > { %v1551_v51 = vpop.eup %1550 }
 0x26a   : > { %v1338_v52 = vmul.f32 0.6931472, %v1551_v51 }
 0x26c   : > { %v1341_v59 = vadd.f32 %v1338_v52, %v1332_v56 }
 0x26d   : > { %v1553_v53 = vpop.eup %1552 }
 0x26e   : > { %v1340_v57 = vmul.f32 0.6931472, %v1553_v53 }
 0x270   : > { %v1342_v60 = vadd.f32 %v1340_v57, %v1334_v58 }
 0x272   : > { %v1343_v61 = vadd.f32 %v1342_v60, %v1341_v59 }
 0x274   : > { %v1344_v62 = vrot.slane %v1343_v61, 4 }
 0x276   : > { %v1345_v63 = vadd.f32 %v1344_v62, %v1343_v61 }
 0x278   : > { %v1346_v0 = vrot.slane %v1345_v63, 2 }
 0x27a   : > { %v1347_v1 = vadd.f32 %v1346_v0, %v1345_v63 }
 0x27c   : > { %v1348_v2 = vrot.slane %v1347_v1, 1 }
 0x27e   : > { %v1349_v3 = vadd.f32 %v1348_v2, %v1347_v1 }
 0x280   : > { %v1350_v4 = vmul.f32 0.01, %v1349_v3 }
 0x282   : > { %1351 = vst [vmem:[%s207_s29] sm:$0xff] %v1350_v4 }
 0x283   : > { %1567 = shalt.err (!%p1564_p3)
}
 0x284   : > { %s1568_s12 = scalar_lea.hbm %s1829_s7, 128  ;;  %s1572_s20 = scalar_lea.hbm %s1875_s4, 896 }
 0x285   : > { %p1569_p4 = scmp.ne.s32.totalorder %s1829_s7, %s1568_s12  ;;  %p1573_p9 = scmp.lt.u32.totalorder %s1829_s7, %s1875_s4 }
 0x286   : > { %p1574_p10 = scmp.lt.u32.totalorder %s1572_s20, %s1568_s12  ;;  %p1576_p12 = scmp.lt.u32.totalorder %s1568_s12, %s1829_s7 }
 0x287   : > { %p1570_p7 = pnand %p1569_p4, %p1683_p5 }
 0x288   : > { %p1575_p11 = por %p1574_p10, %p1573_p9 }
 0x289   : > { %p1571_p8 = pneg %p1570_p7 }
 0x28a   : > { %p1577_p13 = por %p1576_p12, %p1575_p11 }
 0x28c   : > { %p1578_p0 = pnand %p1577_p13, %p1571_p8 }
 0x28e   : > { %1581 = shalt.err (!%p1578_p0)
}
 0x28f   : > { %1490 = dma.vmem_to_hbm [thread:$0]  (%p1683_p5), %s1831_s30, 128, %s1829_s7, %s1353_s8  }
 0x290 PF: > { %p1496_p1 = scmp.ge.s32.totalorder %s1616_s18, 2  ;;  %s1378_s27 = sand.u32 1, %s1604_s15  }
 0x291   : > { %s1379_s28 = scalar_lea.sflag [#allocation3], %s1378_s27 }
 0x292   : > { %p1493_p2 = pnand %p1496_p1, %p1687_p6 }
 0x294   : > { %1599 = dma.done.wait (!%p1493_p2), %s1379_s28, 128  }
 0x295   : > { %1601 = vsyncadd (!%p1493_p2), %s1379_s28, 4294967168  ;;  %p14_p3 = scmp.ge.s32.totalorder %s1670_s21, 9   ;;  %s1878_s15 = smov %s1608_s16 }
 0x296   : > { %s1879_s16 = smov %s1612_s17  ;;  %s1880_s17 = smov %s1681_s24 }
 0x297   : > { %s1881_s18 = smov %s1670_s21  ;;  %16 = sbr.rel (!%p14_p3) target bundleno = 3 (0x3), region = 74 }
 0x29e   :  { %1384 = vsyncpa [#allocation3], 1 }
 0x29f   :  { %1386 = vsyncpa [#allocation3 + $0x1], 1 }

</bundles_post_ra>
